<compile_context>
chip_gen: v7x
topology: tpu7x:2x2x1
jax: 0.10.0
libtpu: 0.0.40
codegen_flags: <defaults>
</compile_context>

<pallas_src>
import math
import jax
import jax.numpy as jnp
from jax.experimental import pallas as pl
from jax.experimental.pallas import tpu as pltpu


# --------------------------------------------------------------------------- kernels

def _mlp_resident_kernel(x_ref, w1_ref, b1_ref, w2_ref, b2_ref, o_ref):
    """Both weight matrices resident in VMEM; one row tile per grid step."""
    h = jnp.dot(x_ref[...], w1_ref[...], preferred_element_type=jnp.float32)
    h = jnp.maximum(h + b1_ref[...], 0.0)
    # TODO(synk): Dropout(p=0.5) is eval-mode identity here; training-mode dropout
    # would use pltpu.prng_seed + pltpu.prng_random_bits with a 2x rescale.
    y = jnp.dot(h.astype(w2_ref.dtype), w2_ref[...], preferred_element_type=jnp.float32)
    o_ref[...] = (y + b2_ref[...]).astype(o_ref.dtype)


def _mlp_ktiled_kernel(x_ref, w1_ref, b1_ref, w2_ref, b2_ref, o_ref, acc_ref):
    """Weights tiled along the hidden dim (K of the 2nd matmul); f32 VMEM accumulator.

    Valid because ReLU(x@W1 + b1) is per-hidden-unit, so each hidden chunk's
    contribution h_chunk @ W2[chunk] can be accumulated independently.
    """
    k = pl.program_id(1)

    @pl.when(k == 0)
    def _():
        acc_ref[...] = jnp.zeros_like(acc_ref)

    h = jnp.dot(x_ref[...], w1_ref[...], preferred_element_type=jnp.float32)
    h = jnp.maximum(h + b1_ref[...], 0.0)
    acc_ref[...] += jnp.dot(h.astype(w2_ref.dtype), w2_ref[...],
                            preferred_element_type=jnp.float32)

    @pl.when(k == pl.num_programs(1) - 1)
    def _():
        o_ref[...] = (acc_ref[...] + b2_ref[...]).astype(o_ref.dtype)


# --------------------------------------------------------------------------- helpers

def _round_up(v, m):
    return ((v + m - 1) // m) * m


def _hw_info():
    """(vmem_capacity_bytes, mxu_m_align, is_v7x) with conservative fallbacks."""
    kind = ""
    try:
        kind = jax.devices()[0].device_kind.lower()
    except Exception:
        pass
    is_v7 = "v7" in kind
    is_v5 = "v5" in kind
    try:
        vmem_cap = int(pltpu.get_tpu_info().vmem_capacity_bytes)
    except Exception:
        vmem_cap = (64 << 20) if is_v7 else (128 << 20)
    m_align = 128 if is_v5 else 256      # MXU M: 4x128^2 (v5e) vs 2x256^2 (v6e/v7x)
    return vmem_cap, m_align, is_v7


def _spec(block_shape, index_map, buffers=None):
    """BlockSpec with an optional explicit pipeline depth (resident weights -> 1)."""
    if buffers is None:
        return pl.BlockSpec(block_shape, index_map)
    try:
        return pl.BlockSpec(block_shape, index_map, pipeline_mode=pl.Buffered(buffers))
    except TypeError:   # jax version without pipeline_mode: fall back to default depth
        return pl.BlockSpec(block_shape, index_map)


def _pick_tile_m(n_rows, bytes_per_row, row_budget, m_align, split_two_way):
    """Largest row tile (<=1024) fitting the per-step VMEM row budget."""
    rows8 = _round_up(max(n_rows, 1), 8)
    cap = min(1024, max(8, max(row_budget, 0) // max(bytes_per_row, 1)))
    cap = (cap // m_align * m_align) if cap >= m_align else (cap // 8 * 8)
    cap = max(cap, 8)
    if rows8 <= cap:
        if split_two_way and rows8 >= 16:
            # v7x only (2 TensorCores/chip): give the "parallel" axis >= 2 entries.
            return max(8, _round_up((rows8 + 1) // 2, 8))
        return rows8
    return cap


# --------------------------------------------------------------------------- wrapper

def prepare_mlp_params(w1, b1, w2, b2, *, use_bf16=True):
    """One-time parameter prep (padding + optional bf16 cast), hoisted off the call path."""
    dim_in, dim_hidden = w1.shape
    dim_out = w2.shape[1]
    # Lane-dense padding. dim_in only padded when large & misaligned; tiny dim_out stays
    # unpadded (full-array last dim is legal; padding 8->128 would 16x the output HBM bytes).
    din_pad = _round_up(dim_in, 128) if dim_in >= 128 else dim_in
    dh_pad = _round_up(dim_hidden, 128)
    dout_pad = _round_up(dim_out, 128) if dim_out >= 64 else dim_out
    # Zero-padded W1/b1 columns give ReLU(0)=0; zero-padded W2 rows/cols add nothing,
    # so results are bit-identical on the real columns.
    w1p = jnp.pad(w1, ((0, din_pad - dim_in), (0, dh_pad - dim_hidden)))
    b1p = jnp.pad(b1.reshape(1, dim_hidden), ((0, 0), (0, dh_pad - dim_hidden)))
    w2p = jnp.pad(w2, ((0, dh_pad - dim_hidden), (0, dout_pad - dim_out)))
    b2p = jnp.pad(b2.reshape(1, dim_out), ((0, 0), (0, dout_pad - dim_out)))
    if use_bf16:
        # bf16 MXU inputs; accumulation stays f32 (preferred_element_type) and biases stay f32.
        w1p = w1p.astype(jnp.bfloat16)
        w2p = w2p.astype(jnp.bfloat16)
    meta = dict(dim_in=dim_in, din_pad=din_pad, dim_hidden=dim_hidden, dh_pad=dh_pad,
                dim_out=dim_out, dout_pad=dout_pad, use_bf16=use_bf16)
    return (w1p, b1p, w2p, b2p), meta


def mlp_forward(x, params, meta, *, tile_m=None, k_tile=None, training=False):
    """x: (..., dim_in) -> (prod(leading dims), dim_out), eval-mode forward."""
    if training:
        # TODO(synk): training-mode Dropout(p=0.5) (in-kernel PRNG + 2x rescale) not implemented.
        raise NotImplementedError("only eval-mode forward is implemented (Dropout == identity)")

    w1p, b1p, w2p, b2p = params
    dim_in, din_pad = meta["dim_in"], meta["din_pad"]
    dh_pad = meta["dh_pad"]
    dim_out, dout_pad = meta["dim_out"], meta["dout_pad"]
    use_bf16 = meta["use_bf16"]

    x2d = x.reshape(-1, x.shape[-1])                       # x.view(-1, x.shape[-1])
    n_rows = x2d.shape[0]
    if din_pad != dim_in:
        x2d = jnp.pad(x2d, ((0, 0), (0, din_pad - dim_in)))
    if use_bf16:
        x2d = x2d.astype(jnp.bfloat16)
    x_sz = jnp.dtype(x2d.dtype).itemsize
    w_sz = jnp.dtype(w1p.dtype).itemsize

    vmem_cap, m_align, is_v7 = _hw_info()
    vmem_budget = int(0.75 * vmem_cap)

    # Resident-weight path footprint (weights single-buffered via Buffered(1)).
    res_weight_bytes = (din_pad * dh_pad + dh_pad * dout_pad) * w_sz + (dh_pad + dout_pad) * 4
    res_bytes_per_row = 2 * din_pad * x_sz + 2 * dout_pad * 4 + dh_pad * 4

    use_ktiled = (k_tile is not None) or (res_weight_bytes + 8 * res_bytes_per_row > vmem_budget)

    flops = 2 * n_rows * (din_pad * dh_pad + dh_pad * dout_pad)
    total_weight_bytes = (din_pad * dh_pad + dh_pad * dout_pad) * w_sz + (dh_pad + dout_pad) * 4
    bytes_acc = n_rows * din_pad * x_sz + total_weight_bytes + n_rows * dout_pad * 4

    if not use_ktiled:
        tile = tile_m or _pick_tile_m(n_rows, res_bytes_per_row,
                                      vmem_budget - res_weight_bytes, m_align, is_v7)
        grid = (pl.cdiv(n_rows, tile),)            # ragged last block masked by Pallas
        footprint = tile * res_bytes_per_row + res_weight_bytes
        vmem_limit = int(min(int(0.9 * vmem_cap), max(48 << 20, footprint + (8 << 20))))
        out = pl.pallas_call(
            _mlp_resident_kernel,
            out_shape=jax.ShapeDtypeStruct((n_rows, dout_pad), jnp.float32),
            grid_spec=pltpu.PrefetchScalarGridSpec(
                num_scalar_prefetch=0,
                grid=grid,
                in_specs=[
                    _spec((tile, din_pad), lambda i: (i, 0)),          # x row tile
                    _spec((din_pad, dh_pad), lambda i: (0, 0), 1),     # W1 resident, 1 buffer
                    _spec((1, dh_pad), lambda i: (0, 0), 1),           # b1 resident
                    _spec((dh_pad, dout_pad), lambda i: (0, 0), 1),    # W2 resident
                    _spec((1, dout_pad), lambda i: (0, 0), 1),         # b2 resident
                ],
                out_specs=pl.BlockSpec((tile, dout_pad), lambda i: (i, 0)),
            ),
            compiler_params=pltpu.CompilerParams(
                dimension_semantics=("parallel",),
                vmem_limit_bytes=vmem_limit,
            ),
            cost_estimate=pl.CostEstimate(flops=int(flops), transcendentals=0,
                                          bytes_accessed=int(bytes_acc)),
        )(x2d, w1p, b1p, w2p, b2p)
    else:
        # K-tiled path: hidden dim split across a reduction grid axis with a VMEM accumulator.
        if k_tile is None:
            groups = dh_pad // 128
            k_tile = 128
            for g in range(groups, 0, -1):          # largest 128-multiple divisor that fits
                if groups % g:
                    continue
                kt = 128 * g
                step_w = 2 * ((din_pad * kt + kt * dout_pad) * w_sz + kt * 4) + dout_pad * 4
                if step_w <= vmem_budget // 2:
                    k_tile = kt
                    break
        assert dh_pad % k_tile == 0, "k_tile must divide the padded hidden dim"
        n_k = dh_pad // k_tile

        kt_weight_bytes = 2 * ((din_pad * k_tile + k_tile * dout_pad) * w_sz
                               + k_tile * 4) + dout_pad * 4
        kt_bytes_per_row = 2 * din_pad * x_sz + 3 * dout_pad * 4 + k_tile * 4
        tile = tile_m or _pick_tile_m(n_rows, kt_bytes_per_row,
                                      vmem_budget - kt_weight_bytes, m_align, is_v7)
        grid = (pl.cdiv(n_rows, tile), n_k)
        footprint = tile * kt_bytes_per_row + kt_weight_bytes
        vmem_limit = int(min(int(0.9 * vmem_cap), max(48 << 20, footprint + (8 << 20))))
        out = pl.pallas_call(
            _mlp_ktiled_kernel,
            out_shape=jax.ShapeDtypeStruct((n_rows, dout_pad), jnp.float32),
            grid_spec=pltpu.PrefetchScalarGridSpec(
                num_scalar_prefetch=0,
                grid=grid,
                in_specs=[
                    _spec((tile, din_pad), lambda i, k: (i, 0)),       # x (not re-fetched over k)
                    _spec((din_pad, k_tile), lambda i, k: (0, k)),     # W1 column tile
                    _spec((1, k_tile), lambda i, k: (0, k)),           # b1 tile
                    _spec((k_tile, dout_pad), lambda i, k: (k, 0)),    # W2 row tile
                    _spec((1, dout_pad), lambda i, k: (0, 0), 1),      # b2 resident
                ],
                out_specs=pl.BlockSpec((tile, dout_pad), lambda i, k: (i, 0)),
                scratch_shapes=[pltpu.VMEM((tile, dout_pad), jnp.float32)],
            ),
            compiler_params=pltpu.CompilerParams(
                dimension_semantics=("parallel", "arbitrary"),
                vmem_limit_bytes=vmem_limit,
            ),
            cost_estimate=pl.CostEstimate(flops=int(flops), transcendentals=0,
                                          bytes_accessed=int(bytes_acc)),
        )(x2d, w1p, b1p, w2p, b2p)

    return out if dout_pad == dim_out else out[:, :dim_out]


def mlp_base_regression(x, w1, b1, w2, b2, *, use_bf16=True, tile_m=None, k_tile=None):
    """Convenience wrapper: prepares (pads/casts) params then runs the fused forward."""
    params, meta = prepare_mlp_params(w1, b1, w2, b2, use_bf16=use_bf16)
    return mlp_forward(x, params, meta, tile_m=tile_m, k_tile=k_tile)


def init_linear_params(key, fan_in, fan_out):
    """PyTorch nn.Linear default init: weight, bias ~ U(-1/sqrt(fan_in), 1/sqrt(fan_in)).
    Weight returned as (fan_in, fan_out) for the x @ W layout."""
    kw, kb = jax.random.split(key)
    bound = 1.0 / math.sqrt(fan_in)
    w = jax.random.uniform(kw, (fan_in, fan_out), jnp.float32, -bound, bound)
    b = jax.random.uniform(kb, (fan_out,), jnp.float32, -bound, bound)
    return w, b


def _reference(x, w1, b1, w2, b2):
    return jnp.maximum(x.reshape(-1, x.shape[-1]) @ w1 + b1, 0.0) @ w2 + b2


if __name__ == "__main__":
    key = jax.random.PRNGKey(0)
    k_x, k_x2, k_x3, k_l1, k_l2, k_l3, k_l4 = jax.random.split(key, 7)

    # --- 1) toy module shapes: (2, 4, 32) -> (8, 8), exact-f32 path ---------------
    dim_in, dim_hidden, dim_out = 32, 64, 8
    w1, b1 = init_linear_params(k_l1, dim_in, dim_hidden)
    w2, b2 = init_linear_params(k_l2, dim_hidden, dim_out)
    params_f32, meta_f32 = prepare_mlp_params(w1, b1, w2, b2, use_bf16=False)  # hoisted prep
    x = jax.random.normal(k_x, (2, 4, dim_in), jnp.float32)
    out = jax.block_until_ready(mlp_forward(x, params_f32, meta_f32))
    ref = _reference(x, w1, b1, w2, b2)
    assert out.shape == (8, dim_out)
    assert jnp.allclose(out, ref, atol=1e-5, rtol=1e-5)

    # --- 2) ragged 300-row batch: exact-f32 path + default bf16 MXU path ----------
    x_big = jax.random.normal(k_x2, (3, 100, dim_in), jnp.float32)
    out_f32 = jax.block_until_ready(mlp_forward(x_big, params_f32, meta_f32))
    ref_big = _reference(x_big, w1, b1, w2, b2)
    assert out_f32.shape == (300, dim_out)
    assert jnp.allclose(out_f32, ref_big, atol=1e-5, rtol=1e-5)

    out_bf16 = jax.block_until_ready(mlp_base_regression(x_big, w1, b1, w2, b2))
    assert out_bf16.shape == (300, dim_out)
    assert jnp.allclose(out_bf16, ref_big, atol=1e-1, rtol=1e-1)

    # --- 3) K-tiled weight path (hidden dim tiled) + padded-dim_out branch --------
    d_in3, d_hid3, d_out3 = 32, 256, 72
    w1b, b1b = init_linear_params(k_l3, d_in3, d_hid3)
    w2b, b2b = init_linear_params(k_l4, d_hid3, d_out3)
    x3 = jax.random.normal(k_x3, (4, 16, d_in3), jnp.float32)
    out3 = jax.block_until_ready(
        mlp_base_regression(x3, w1b, b1b, w2b, b2b, use_bf16=False, k_tile=128))
    ref3 = _reference(x3, w1b, b1b, w2b, b2b)
    assert out3.shape == (64, d_out3)
    assert jnp.allclose(out3, ref3, atol=1e-5, rtol=1e-5)

    print("KERNEL_OK")
</pallas_src>

<mosaic_0001>
module attributes {stable_mosaic.version = 11 : i64} {
  func.func @_mlp_resident_kernel(%arg0: i32, %arg1: memref<8x32xf32, #tpu.memory_space<vmem>>, %arg2: memref<32x128xf32, #tpu.memory_space<vmem>>, %arg3: memref<1x128xf32, #tpu.memory_space<vmem>>, %arg4: memref<128x8xf32, #tpu.memory_space<vmem>>, %arg5: memref<1x8xf32, #tpu.memory_space<vmem>>, %arg6: memref<8x8xf32, #tpu.memory_space<vmem>>) attributes {dimension_semantics = [#tpu.dimension_semantics<parallel>], iteration_bounds = array<i64: 1>, scalar_prefetch = 0 : i64, scratch_operands = 0 : i64, tpu.core_type = #tpu.core_type<tc>, window_params = [{transform_indices = @transform_0, window_bounds = array<i64: 8, 32>}, {pipeline_mode = #tpu.pipeline_mode<synchronous>, transform_indices = @transform_1, window_bounds = array<i64: 32, 128>}, {pipeline_mode = #tpu.pipeline_mode<synchronous>, transform_indices = @transform_2, window_bounds = array<i64: 1, 128>}, {pipeline_mode = #tpu.pipeline_mode<synchronous>, transform_indices = @transform_3, window_bounds = array<i64: 128, 8>}, {pipeline_mode = #tpu.pipeline_mode<synchronous>, transform_indices = @transform_4, window_bounds = array<i64: 1, 8>}, {transform_indices = @transform_5, window_bounds = array<i64: 8, 8>}]} {
    %c0 = arith.constant 0 : index
    %c0_0 = arith.constant 0 : index
    %0 = vector.load %arg1[%c0, %c0_0] : memref<8x32xf32, #tpu.memory_space<vmem>>, vector<8x32xf32>
    %c0_1 = arith.constant 0 : index
    %c0_2 = arith.constant 0 : index
    %1 = vector.load %arg2[%c0_1, %c0_2] : memref<32x128xf32, #tpu.memory_space<vmem>>, vector<32x128xf32>
    %cst = arith.constant dense<0.000000e+00> : vector<8x128xf32>
    %2 = tpu.matmul %0, %1, %cst {dimension_numbers = #tpu.dot_dimension_numbers<[1], [0], [0], [1], [0, 0, 1, 1], [], []>} : vector<8x32xf32>, vector<32x128xf32>, vector<8x128xf32> -> vector<8x128xf32>
    %c0_3 = arith.constant 0 : index
    %c0_4 = arith.constant 0 : index
    %3 = vector.load %arg3[%c0_3, %c0_4] : memref<1x128xf32, #tpu.memory_space<vmem>>, vector<1x128xf32>
    %4 = vector.broadcast %3 : vector<1x128xf32> to vector<8x128xf32>
    %5 = arith.addf %2, %4 : vector<8x128xf32>
    %cst_5 = arith.constant 0.000000e+00 : f32
    %6 = vector.broadcast %cst_5 : f32 to vector<8x128xf32>
    %7 = arith.maximumf %5, %6 : vector<8x128xf32>
    %c0_6 = arith.constant 0 : index
    %c0_7 = arith.constant 0 : index
    %8 = vector.load %arg4[%c0_6, %c0_7] : memref<128x8xf32, #tpu.memory_space<vmem>>, vector<128x8xf32>
    %cst_8 = arith.constant dense<0.000000e+00> : vector<8x8xf32>
    %9 = tpu.matmul %7, %8, %cst_8 {dimension_numbers = #tpu.dot_dimension_numbers<[1], [0], [0], [1], [0, 0, 1, 1], [], []>} : vector<8x128xf32>, vector<128x8xf32>, vector<8x8xf32> -> vector<8x8xf32>
    %c0_9 = arith.constant 0 : index
    %c0_10 = arith.constant 0 : index
    %10 = vector.load %arg5[%c0_9, %c0_10] : memref<1x8xf32, #tpu.memory_space<vmem>>, vector<1x8xf32>
    %11 = vector.broadcast %10 : vector<1x8xf32> to vector<8x8xf32>
    %12 = arith.addf %9, %11 : vector<8x8xf32>
    %c0_11 = arith.constant 0 : index
    %c0_12 = arith.constant 0 : index
    %13 = vector.load %arg6[%c0_11, %c0_12] : memref<8x8xf32, #tpu.memory_space<vmem>>, vector<8x8xf32>
    tpu.vector_store %arg6[%c0_11, %c0_12], %12 {strides = array<i32>} : memref<8x8xf32, #tpu.memory_space<vmem>>, vector<8x8xf32>,
    return
  }
  func.func @transform_0(%arg0: i32) -> (i32, i32) {
    %c0_i32 = arith.constant 0 : i32
    %c0_i32_0 = arith.constant 0 : i32
    return %arg0, %c0_i32 : i32, i32
  }
  func.func @transform_1(%arg0: i32) -> (i32, i32) {
    %c0_i32 = arith.constant 0 : i32
    %c0_i32_0 = arith.constant 0 : i32
    %c0_i32_1 = arith.constant 0 : i32
    return %c0_i32, %c0_i32_0 : i32, i32
  }
  func.func @transform_2(%arg0: i32) -> (i32, i32) {
    %c0_i32 = arith.constant 0 : i32
    %c0_i32_0 = arith.constant 0 : i32
    %c0_i32_1 = arith.constant 0 : i32
    return %c0_i32, %c0_i32_0 : i32, i32
  }
  func.func @transform_3(%arg0: i32) -> (i32, i32) {
    %c0_i32 = arith.constant 0 : i32
    %c0_i32_0 = arith.constant 0 : i32
    %c0_i32_1 = arith.constant 0 : i32
    return %c0_i32, %c0_i32_0 : i32, i32
  }
  func.func @transform_4(%arg0: i32) -> (i32, i32) {
    %c0_i32 = arith.constant 0 : i32
    %c0_i32_0 = arith.constant 0 : i32
    %c0_i32_1 = arith.constant 0 : i32
    return %c0_i32, %c0_i32_0 : i32, i32
  }
  func.func @transform_5(%arg0: i32) -> (i32, i32) {
    %c0_i32 = arith.constant 0 : i32
    %c0_i32_0 = arith.constant 0 : i32
    return %arg0, %c0_i32 : i32, i32
  }
}

</mosaic_0001>

<bundles_post_ra>
// kernel: tpu_custom_call.1
= control target key start
LH: loop header
LB: loop body
LE: loop exit
PB: predicated region body
PF: predicated region fallthrough
CT: control target
= control target key end

     0   :  { %v346_v3 = vmov 0.0|0.0   ;;  %vm347_vm0 = vmmov 0   ;;  %v348_v6 = vmov 0.0   ;;  %s461_s0 = inlined_call_operand.vmem [shape: f32[8,32], index: 0, kind: input, shape index: {}]   ;;  %s462_s1 = inlined_call_operand.vmem [shape: f32[32,128], index: 1, kind: input, shape index: {}]   ;;  %s463_s2 = inlined_call_operand.vmem [shape: f32[1,128], index: 2, kind: input, shape index: {}]   ;;  %s464_s3 = inlined_call_operand.vmem [shape: f32[128,8], index: 3, kind: input, shape index: {}]   ;;  %s465_s4 = inlined_call_operand.vmem [shape: f32[1,8], index: 4, kind: input, shape index: {}]   ;;  %s466_s5 = inlined_call_operand.hbm [shape: f32[8,8], index: 5, kind: output, shape index: {}]  }
   0x1   :  { %v22_v0 = vld [vmem:[%s462_s1] sm:$0xff]  ;;  %v23_v1 = vld [vmem:[%s462_s1 + $0x8] sm:$0xff]  ;;  %v24_v2 = vld [vmem:[%s462_s1 + $0x10] sm:$0xff]  ;;  %288 = vmatprep.subr.bf16.mxu0 %v346_v3  ;;  %250 = vmatprep.mubr.msk.f32.mxu0 %vm347_vm0, %v348_v6 }
   0x2   :  { %v289_v4 = vpack.c.bf16 %v23_v1, %v22_v0  ;;  %v25_v5 = vld [vmem:[%s462_s1 + $0x18] sm:$0xff]  ;;  %v108_v7 = vld [vmem:[%s464_s3] sm:$0xff]  ;;  %294 = vmatprep.subr.bf16.mxu1 %v346_v3  ;;  %v109_v8 = vld [vmem:[%s464_s3 + $0x8] sm:$0xff]  ;;  %285 = vmatprep.mubr.msk.f32.mxu1 %vm347_vm0, %v348_v6 }
   0x3   :  { %v110_v9 = vld [vmem:[%s464_s3 + $0x10] sm:$0xff]  ;;  %v111_v10 = vld [vmem:[%s464_s3 + $0x18] sm:$0xff]  ;;  %v292_v11 = vpack.c.bf16 %v25_v5, %v24_v2  ;;  %v295_v12 = vpack.c.bf16 %v109_v8, %v108_v7  ;;  %v112_v14 = vld [vmem:[%s464_s3 + $0x20] sm:$0xff] }
   0x4   :  { %290 = vmatpush3.bf16.msra.mxu0 %v289_v4  ;;  %v298_v13 = vpack.c.bf16 %v111_v10, %v110_v9  ;;  %v113_v15 = vld [vmem:[%s464_s3 + $0x28] sm:$0xff] }
   0x5   :  { %291 = vmatprep.subr.bf16.mxu0 %v346_v3  ;;  %296 = vmatpush3.bf16.msra.mxu1 %v295_v12 }
   0x6   :  { %297 = vmatprep.subr.bf16.mxu1 %v346_v3 }
   0x7   :  { %10 = vsyncpa [#allocation3], 0  ;;  %v21_v16 = vld [vmem:[%s461_s0] sm:$0xff]  ;;  %vm33_vm1 = vcmask 261120   ;;  %v301_v17 = vpack.c.bf16 %v113_v15, %v112_v14  ;;  %v114_v18 = vld [vmem:[%s464_s3 + $0x30] sm:$0xff]  ;;  %s349_s11 = smov [#allocation2]  }
   0x8   :  { %293 = vmatpush3.bf16.msra.mxu0 %v292_v11  ;;  %v115_v19 = vld [vmem:[%s464_s3 + $0x38] sm:$0xff]  ;;  %v116_v21 = vld [vmem:[%s464_s3 + $0x40] sm:$0xff]  ;;  %v117_v22 = vld [vmem:[%s464_s3 + $0x48] sm:$0xff]  ;;  %s209_s12 = sshll.u32 %s349_s11, 4  ;;  %vm201_vm2 = vcmask 64512   ;;  %s210_s12 = int_to_ptr.vmem [resolvable:$true] %s209_s12 }
   0x9   :  { %299 = vmatpush3.bf16.msra.mxu1 %v298_v13  ;;  %v304_v20 = vpack.c.bf16 %v115_v19, %v114_v18  ;;  %v307_v23 = vpack.c.bf16 %v117_v22, %v116_v21  ;;  %v118_v24 = vld [vmem:[%s464_s3 + $0x50] sm:$0xff]  ;;  %v119_v25 = vld [vmem:[%s464_s3 + $0x58] sm:$0xff]  ;;  %v120_v27 = vld [vmem:[%s464_s3 + $0x60] sm:$0xff]  ;;  %p327_p1 = scmp.lt.s32.totalorder %s210_s12, %s210_s12 }
   0xa   :  { %300 = vmatprep.subr.bf16.mxu1 %v346_v3  ;;  %v310_v26 = vpack.c.bf16 %v119_v25, %v118_v24  ;;  %v121_v28 = vld [vmem:[%s464_s3 + $0x68] sm:$0xff]  ;;  %v122_v30 = vld [vmem:[%s464_s3 + $0x70] sm:$0xff]  ;;  %v123_v31 = vld [vmem:[%s464_s3 + $0x78] sm:$0xff]  ;;  %s322_s3 = scalar_lea.vmem %s210_s12, 128 }
   0xb   :  { %251 = vmatmul.mubr.msk.f32.vlgmr.msra.gmra.mrb[0].mxu0 %vm33_vm1, %v21_v16  ;;  %v313_v29 = vpack.c.bf16 %v121_v28, %v120_v27  ;;  %v316_v32 = vpack.c.bf16 %v123_v31, %v122_v30  ;;  %v217_v33 = vld [vmem:[%s463_s2] ss:$0 sm:$0xff]  ;;  %p323_p0 = scmp.ne.s32.totalorder %s210_s12, %s322_s3  ;;  %p328_p2 = scmp.lt.s32.totalorder %s322_s3, %s322_s3 }
   0xc   :  { %v219_v38 = vld [vmem:[%s465_s4] ss:$0 sm:$0xff] }
   0xd   :  { %302 = vmatpush3.bf16.msra.mxu1 %v301_v17  ;;  %p329_p3 = por %p328_p2, %p327_p1 }
   0xe   :  { %303 = vmatprep.subr.bf16.mxu1 %v346_v3 }
   0xf   :  { %p330_p4 = pnand %p329_p3, %p323_p0 }
  0x11   :  { %305 = vmatpush3.bf16.msra.mxu1 %v304_v20 }
  0x12   :  { %306 = vmatprep.subr.bf16.mxu1 %v346_v3 }
  0x15   :  { %308 = vmatpush3.bf16.msra.mxu1 %v307_v23 }
  0x16   :  { %309 = vmatprep.subr.bf16.mxu1 %v346_v3 }
  0x19   :  { %311 = vmatpush3.bf16.msra.mxu1 %v310_v26 }
  0x1a   :  { %312 = vmatprep.subr.bf16.mxu1 %v346_v3 }
  0x1d   :  { %314 = vmatpush3.bf16.msra.mxu1 %v313_v29 }
  0x1e   :  { %315 = vmatprep.subr.bf16.mxu1 %v346_v3 }
  0x21   :  { %317 = vmatpush3.bf16.msra.mxu1 %v316_v32 }
  0xde   :  { %v103_v34 = vpop.f32.mrb[0].mxu0 }
  0xdf   :  { %v104_v35 = vadd.f32 %v217_v33, %v103_v34  ;;  %v252_v36 = vpop.f32.mrb[1].mxu0 }
  0xe1   :  { %v107_v37 = vmax.f32 %v104_v35, 0.0 }
  0xe3   :  { %286 = vmatmul.mubr.f32.vlgmr.msra.gmra.mrb[0].mxu1 %v107_v37 }
 0x1b6   :  { %v197_v39 = vpop.f32.mrb[0].mxu1 }
 0x1b7   :  { %v198_v40 = vadd.f32 %v219_v38, %v197_v39  ;;  %v287_v41 = vpop.f32.mrb[1].mxu1 }
 0x1b9   :  { %202 = vst.msk [vmem:[#allocation2] sm:$0xff] %vm201_vm2, %v198_v40 }
 0x1ba   :  { %333 = shalt.err (!%p330_p4)
}
 0x1bb   :  { %s334_s14 = scalar_lea.hbm %s466_s5, 128 }
 0x1bc   :  { %p335_p5 = scmp.ne.s32.totalorder %s466_s5, %s334_s14  ;;  %p338_p6 = scmp.lt.u32.totalorder %s334_s14, %s466_s5 }
 0x1be   :  { %p340_p7 = pnand %p338_p6, %p335_p5 }
 0x1c0   :  { %343 = shalt.err (!%p340_p7)
}
 0x1c1   :  { %212 = dma.vmem_to_hbm [thread:$0]  %s210_s12, 128, %s466_s5, [#allocation3]  }
 0x1c2   :  { %344 = dma.done.wait [#allocation3], 128  }
 0x1c3   :  { %345 = vsyncadd [#allocation3], 4294967168 }
 0x1c4   :  { %216 = vsyncpa [#allocation3], 1 }

</bundles_post_ra>
